<compile_context>
chip_gen: v7x
topology: tpu7x:2x2x1
jax: 0.10.0
libtpu: 0.0.40
codegen_flags: <defaults>
</compile_context>

<pallas_src>
import functools
import math

import jax
import jax.numpy as jnp
from jax import lax
from jax.experimental import pallas as pl
from jax.experimental.pallas import tpu as pltpu


def _round_up(a: int, b: int) -> int:
    return ((a + b - 1) // b) * b


def _pe_add_kernel(div_ref, ang0_ref, x_ref, o_ref, *, row_tile: int,
                   pos_per_row: int):
    """Processes one (1, row_tile, W) lane-dense tile of the (B, R, W) view.

    For batch b, row r, lane l the underlying element is x[b, s, d] with
        d = l % D                      (W is a multiple of D)
        s = r * (W // D) + l // D
    and PE[s, d] = sin(s * div_term[d] + phase[d]).

    div_ref  : (1, W) f32  div_term per lane                 (VMEM resident)
    ang0_ref : (1, W) f32  (l // D) * div_term + phase       (VMEM resident)
    """
    rb = pl.program_id(1)
    w = div_ref.shape[1]

    # exact integer global row index -> row contribution to the position s
    row = lax.broadcasted_iota(jnp.int32, (row_tile, w), 0) + rb * row_tile
    pos_row = (row * pos_per_row).astype(jnp.float32)          # = s - l // D

    angle = pos_row * div_ref[...] + ang0_ref[...]             # (row_tile, W)
    pe = jnp.sin(angle)                                        # single EUP op

    o_ref[0] = (x_ref[0].astype(jnp.float32) + pe).astype(o_ref.dtype)


def sinusoidal_positional_encoding(x: jax.Array, *,
                                   max_block_elems: int = 512 * 1024) -> jax.Array:
    """x: (B, S, D) float.  Returns x + sinusoidal positional encoding."""
    B, S, D = x.shape
    assert D % 2 == 0, "d_model must be even (as implied by the PyTorch module)"
    L = S * D

    # ---- lane-dense view: per batch, flatten (S, D) -> L and view as (R, W),
    # W a multiple of lcm(128, D), targeting ~1024 lanes.
    w_base = (128 * D) // math.gcd(128, D)               # lcm(128, D)
    k = max(1, min(L // w_base, -(-1024 // w_base)))     # ~1024 lanes
    W = w_base * k

    r_raw = -(-L // W)                                   # cdiv(L, W)
    rt_cap = max(8, (max_block_elems // W) // 8 * 8)     # rows/block, multiple of 8
    if r_raw <= rt_cap:
        row_tile, R = r_raw, r_raw                       # one full block per batch
    else:
        row_tile = rt_cap
        R = _round_up(r_raw, rt_cap)                     # exact grid division
    L_pad = R * W

    xf = x.reshape(B, L)
    if L_pad != L:
        # TODO(synk): padding copies x once; avoidable with in-kernel tail masking.
        xf = jnp.pad(xf, ((0, 0), (0, L_pad - L)))
    xf = xf.reshape(B, R, W)

    # ---- per-lane constants (computed once; resident in VMEM across the grid)
    lane = jnp.arange(W, dtype=jnp.int32)
    d_idx = lane % D
    pair = (2 * (d_idx // 2)).astype(jnp.float32)
    div_term = jnp.exp(pair * jnp.float32(-math.log(10000.0) / D))        # (W,)
    phase = (d_idx % 2).astype(jnp.float32) * jnp.float32(math.pi / 2.0)
    lane_ang0 = (lane // D).astype(jnp.float32) * div_term + phase        # (W,)
    div_term = div_term.reshape(1, W)
    lane_ang0 = lane_ang0.reshape(1, W)

    kernel = functools.partial(_pe_add_kernel, row_tile=row_tile,
                               pos_per_row=W // D)

    out = pl.pallas_call(
        kernel,
        out_shape=jax.ShapeDtypeStruct((B, R, W), x.dtype),
        grid_spec=pltpu.PrefetchScalarGridSpec(
            num_scalar_prefetch=0,
            grid=(B, R // row_tile),
            in_specs=[
                pl.BlockSpec((1, W), lambda b, r: (0, 0)),               # div_term
                pl.BlockSpec((1, W), lambda b, r: (0, 0)),               # lane_ang0
                pl.BlockSpec((1, row_tile, W), lambda b, r: (b, r, 0)),  # x tile
            ],
            out_specs=pl.BlockSpec((1, row_tile, W), lambda b, r: (b, r, 0)),
        ),
        compiler_params=pltpu.CompilerParams(
            dimension_semantics=("parallel", "parallel"),
            vmem_limit_bytes=32 * 1024 * 1024,
        ),
    )(div_term, lane_ang0, xf)

    return out.reshape(B, L_pad)[:, :L].reshape(B, S, D)


def _reference(x: jax.Array) -> jax.Array:
    # pure-JAX mirror of the PyTorch forward
    B, S, D = x.shape
    position = jnp.arange(S, dtype=jnp.float32)[:, None]
    div_term = jnp.exp(
        jnp.arange(0, D, 2, dtype=jnp.float32) * (-math.log(10000.0) / D))
    pe = jnp.zeros((S, D), jnp.float32)
    pe = pe.at[:, 0::2].set(jnp.sin(position * div_term))
    pe = pe.at[:, 1::2].set(jnp.cos(position * div_term))
    return x + pe[None]


if __name__ == "__main__":
    key = jax.random.PRNGKey(0)

    cases = [
        dict(shape=(2, 16, 4), kwargs={}),                              # module-like d_model=4 (padded lanes)
        dict(shape=(2, 16, 32), kwargs={}),                             # exactly lane-aligned, single block
        dict(shape=(2, 300, 32), kwargs=dict(max_block_elems=2048)),    # multi row-block + tail padding
    ]
    for c in cases:
        key, sub = jax.random.split(key)
        x = jax.random.normal(sub, c["shape"], dtype=jnp.float32)
        out = jax.block_until_ready(sinusoidal_positional_encoding(x, **c["kwargs"]))
        ref = _reference(x)
        assert out.shape == x.shape
        assert jnp.allclose(out, ref, atol=1e-4, rtol=1e-4), c

    print("KERNEL_OK")
</pallas_src>

<mosaic_0001>
module attributes {stable_mosaic.version = 11 : i64} {
  func.func @_pe_add_kernel(%arg0: i32, %arg1: i32, %arg2: memref<1x128xf32, #tpu.memory_space<vmem>>, %arg3: memref<1x128xf32, #tpu.memory_space<vmem>>, %arg4: memref<1x1x128xf32, #tpu.memory_space<vmem>>, %arg5: memref<1x1x128xf32, #tpu.memory_space<vmem>>) attributes {dimension_semantics = [#tpu.dimension_semantics<parallel>, #tpu.dimension_semantics<parallel>], iteration_bounds = array<i64: 2, 1>, scalar_prefetch = 0 : i64, scratch_operands = 0 : i64, tpu.core_type = #tpu.core_type<tc>, window_params = [{pipeline_mode = #tpu.pipeline_mode<synchronous>, transform_indices = @transform_0, window_bounds = array<i64: 1, 128>}, {pipeline_mode = #tpu.pipeline_mode<synchronous>, transform_indices = @transform_1, window_bounds = array<i64: 1, 128>}, {transform_indices = @transform_2, window_bounds = array<i64: 1, 1, 128>}, {transform_indices = @transform_3, window_bounds = array<i64: 1, 1, 128>}]} {
    %0 = tpu.iota {dimensions = array<i32: 0>} : vector<1x128xi32>
    %c1_i32 = arith.constant 1 : i32
    %1 = arith.muli %arg1, %c1_i32 : i32
    %2 = vector.broadcast %1 : i32 to vector<1x128xi32>
    %3 = arith.addi %0, %2 : vector<1x128xi32>
    %c32_i32 = arith.constant 32 : i32
    %4 = vector.broadcast %c32_i32 : i32 to vector<1x128xi32>
    %5 = arith.muli %3, %4 : vector<1x128xi32>
    %6 = arith.sitofp %5 : vector<1x128xi32> to vector<1x128xf32>
    %c0 = arith.constant 0 : index
    %c0_0 = arith.constant 0 : index
    %7 = vector.load %arg2[%c0, %c0_0] : memref<1x128xf32, #tpu.memory_space<vmem>>, vector<1x128xf32>
    %8 = arith.mulf %6, %7 : vector<1x128xf32>
    %c0_1 = arith.constant 0 : index
    %c0_2 = arith.constant 0 : index
    %9 = vector.load %arg3[%c0_1, %c0_2] : memref<1x128xf32, #tpu.memory_space<vmem>>, vector<1x128xf32>
    %10 = arith.addf %8, %9 : vector<1x128xf32>
    %11 = math.sin %10 : vector<1x128xf32>
    %c0_3 = arith.constant 0 : index
    %c0_4 = arith.constant 0 : index
    %c0_5 = arith.constant 0 : index
    %12 = vector.load %arg4[%c0_3, %c0_4, %c0_5] : memref<1x1x128xf32, #tpu.memory_space<vmem>>, vector<1x1x128xf32>
    %13 = vector.shape_cast %12 : vector<1x1x128xf32> to vector<1x128xf32>
    %14 = arith.addf %13, %11 : vector<1x128xf32>
    %c0_6 = arith.constant 0 : index
    %c0_7 = arith.constant 0 : index
    %c0_8 = arith.constant 0 : index
    %15 = vector.load %arg5[%c0_6, %c0_7, %c0_8] : memref<1x1x128xf32, #tpu.memory_space<vmem>>, vector<1x1x128xf32>
    %16 = vector.shape_cast %15 : vector<1x1x128xf32> to vector<1x128xf32>
    %17 = vector.shape_cast %14 : vector<1x128xf32> to vector<1x1x128xf32>
    tpu.vector_store %arg5[%c0_6, %c0_7, %c0_8], %17 {strides = array<i32>} : memref<1x1x128xf32, #tpu.memory_space<vmem>>, vector<1x1x128xf32>,
    return
  }
  func.func @transform_0(%arg0: i32, %arg1: i32) -> (i32, i32) {
    %c0_i32 = arith.constant 0 : i32
    %c0_i32_0 = arith.constant 0 : i32
    %c0_i32_1 = arith.constant 0 : i32
    return %c0_i32, %c0_i32_0 : i32, i32
  }
  func.func @transform_1(%arg0: i32, %arg1: i32) -> (i32, i32) {
    %c0_i32 = arith.constant 0 : i32
    %c0_i32_0 = arith.constant 0 : i32
    %c0_i32_1 = arith.constant 0 : i32
    return %c0_i32, %c0_i32_0 : i32, i32
  }
  func.func @transform_2(%arg0: i32, %arg1: i32) -> (i32, i32, i32) {
    %c0_i32 = arith.constant 0 : i32
    %c0_i32_0 = arith.constant 0 : i32
    return %arg0, %arg1, %c0_i32 : i32, i32, i32
  }
  func.func @transform_3(%arg0: i32, %arg1: i32) -> (i32, i32, i32) {
    %c0_i32 = arith.constant 0 : i32
    %c0_i32_0 = arith.constant 0 : i32
    return %arg0, %arg1, %c0_i32 : i32, i32, i32
  }
}

</mosaic_0001>

<bundles_post_ra>
// kernel: tpu_custom_call.1
= control target key start
LH: loop header
LB: loop body
LE: loop exit
PB: predicated region body
PF: predicated region fallthrough
CT: control target
= control target key end

     0   :  { %8 = vsyncpa [#allocation3], 0  ;;  %s815_s0 = inlined_call_operand.hbm [shape: f32[1,128], index: 0, kind: input, shape index: {}]   ;;  %s816_s1 = inlined_call_operand.vmem [shape: f32[1,128], index: 1, kind: input, shape index: {}]   ;;  %s817_s2 = inlined_call_operand.vmem [shape: f32[2,1,128], index: 2, kind: input, shape index: {}]   ;;  %s818_s3 = inlined_call_operand.hbm [shape: f32[2,1,128], index: 3, kind: output, shape index: {}]  }
   0x1   :  { %9 = vsyncpa [#allocation4], 0 }
   0x2   :  { %11 = vsyncpa [#allocation4 + $0x1], 0  ;;  %s641_s12 = smov 0   ;;  %s643_s13 = smov 0  }
   0x3   :  { %s645_s14 = smov 0   ;;  %s647_s15 = smov 0  }
   0x4   :  { %s649_s16 = smov 0   ;;  %s651_s17 = smov 0  }
   0x5 LB: > { %s407_s18 = sadd.s32 4294967295, %s611_s17   ;;  %s408_s19 = sadd.s32 4294967294, %s611_s17   ;;  %s611_s17 = sphi %s651_s17, %s17_s17   ;;  %s607_s16 = sphi %s649_s16, %s836_s16   ;;  %s603_s15 = sphi %s647_s15, %s835_s15   ;;  %s599_s14 = sphi %s645_s14, %s834_s14   ;;  %s595_s13 = sphi %s643_s13, %s833_s13   ;;  %s591_s12 = sphi %s641_s12, %s832_s12  }
   0x6   : > { %s29_s20 = sadd.s32 1, %s607_s16  ;;  %s108_s21 = sadd.s32 1, %s599_s14 }
   0x7   : > { %p31_p0 = scmp.ge.s32.totalorder %s29_s20, 2  ;;  %p118_p1 = scmp.ne.s32.totalorder %s599_s14, %s595_s13 }
   0x8   : > { %p119_p2 = scmp.eq.s32.totalorder %s407_s18, 1  ;;  %p124_p3 = scmp.ne.s32.totalorder %s595_s13, %s591_s12 }
   0x9   : > { %s838_s20 = smov (%p31_p0, %s29_s20), 0  ;;  %p125_p5 = scmp.eq.s32.totalorder %s408_s19, 1 }
   0xa   : > { %p681_p4 = por %p119_p2, %p118_p1  ;;  %s103_s23 = ssub.s32 %s607_s16, %s838_s20 }
   0xb   : > { %p409_p6 = scmp.ge.s32.totalorder %s611_s17, 1  ;;  %p106_p7 = scmp.eq.s32.totalorder %s103_s23, 0 }
   0xc   : > { %s823_s22 = scalar_select %p681_p4, 1, 0 }
   0xd   : > { %p688_p8 = por %p125_p5, %p124_p3  ;;  %p132_p9 = scmp.lt.s32.totalorder %s611_s17, 3 }
   0xe   : > { %s694_s25 = scalar_select %p106_p7, %s599_s14, %s108_s21  }
   0xf   : > { %s824_s24 = scalar_select %p688_p8, 1, 0 }
  0x10   : > { %p696_p10 = pnand %p409_p6, %p132_p9  ;;  %p700_p11 = scmp.eq.s32.totalorder %s407_s18, 0 }
  0x11   : > { %s613_s28 = smov [#allocation2]   ;;  %s501_s6 = scalar_lea.hbm %s815_s0, 16 }
  0x12   : > { %s825_s26 = scalar_select %p696_p10, 1, 0 }
  0x13   : > { %s826_s27 = scalar_select %p700_p11, 1, 0 }
  0x14   : > { %p431_p12 = pneg %p696_p10  ;;  %s145_s29 = sshll.u32 %s613_s28, 4  ;;  %s146_s29 = int_to_ptr.vmem [resolvable:$true] %s145_s29 }
  0x15   : > { %p502_p0 = scmp.ne.s32.totalorder %s815_s0, %s501_s6  ;;  %p508_p5 = scmp.lt.u32.totalorder %s501_s6, %s815_s0 }
  0x16   : > { %p708_p13 = pnand %p700_p11, %p431_p12 }
  0x18   : > { %p503_p1 = pneg %p708_p13 }
  0x1a   : > { %p504_p2 = pnand %p503_p1, %p502_p0 }
  0x1c   : > { %p505_p3 = pneg %p504_p2 }
  0x1e   : > { %p510_p6 = pnand %p508_p5, %p505_p3 }
  0x20   : > { %513 = shalt.err (!%p510_p6)
}
  0x21   : > { %s514_s11 = scalar_lea.vmem %s146_s29, 16  ;;  %s521_s18 = scalar_lea.vmem %s146_s29, 32 }
  0x22   : > { %p515_p7 = scmp.ne.s32.totalorder %s146_s29, %s514_s11  ;;  %p522_p8 = scmp.lt.s32.totalorder %s146_s29, %s146_s29 }
  0x23   : > { %p523_p4 = scmp.lt.s32.totalorder %s521_s18, %s514_s11 }
  0x24   : > { %p517_p9 = pnand %p515_p7, %p503_p1 }
  0x25   : > { %p524_p11 = por %p523_p4, %p522_p8 }
  0x26   : > { %p518_p12 = pneg %p517_p9 }
  0x28   : > { %p525_p10 = pnand %p524_p11, %p518_p12 }
  0x2a   : > { %528 = shalt.err (!%p525_p10)
}
  0x2b   : > { %434 = dma.hbm_to_vmem [thread:$0]  (!%p708_p13), %s815_s0, 16, %s146_s29, [#allocation3]  }
  0x2c   : > { %p828_p0 = scmp.ne.s32.totalorder %s825_s26, 0 }
  0x2d   : > { %p829_p2 = scmp.ne.s32.totalorder (!%p828_p0), %s826_s27, 0 }
  0x2e   : > { %170 = sbr.rel (%p828_p0) target bundleno = 162 (0xa2), region = 32 }
  0x35   : > { %582 = dma.done.wait (%p829_p2), [#allocation3], 16  }
  0x36   : > { %584 = vsyncadd (%p829_p2), [#allocation3], 4294967280  ;;  %v200_v0 = vlaneseq  ;;  %v206_v4 = vld [vmem:[#allocation2] sm:$0x1]  ;;  %v208_v5 = vld [vmem:[%s816_s1] sm:$0x1] }
  0x37   : > { %v614_v19 = vmov 683565275   ;;  %v615_v21 = vmov 2475754826   ;;  %v616_v23 = vmov 2131351028  }
  0x38   : > { %v201_v1 = vshrl.u32 %v200_v0, 7  ;;  %v617_v25 = vmov 2102212464   ;;  %v618_v27 = vmov 920167782   ;;  %p194_p4 = scmp.lt.s32.totalorder %s603_s15, 1 }
  0x39   : > { %v619_v34 = vmov 1326507024   ;;  %s192_s27 = sand.u32 1, %s595_s13   ;;  %s418_s7 = sshll.u32 %s603_s15, 4 }
  0x3a   : > { %v204_v2 = vmul.u32 32, %v201_v1  ;;  %s195_s26 = scalar_select %p194_p4, %s603_s15, 1 }
  0x3b   : > { %s193_s5 = scalar_lea.vmem [#allocation5], %s192_s27  ;;  %s770_s10 = scalar_lea.hbm %s818_s3, %s418_s7 }
  0x3c   : > { %v205_v3 = vcvt.s32.f32 %v204_v2  ;;  %s199_s4 = scalar_lea.vmem %s817_s2, %s195_s26  ;;  %s331_s6 = sshll.u32 %s193_s5, 4  ;;  %s765_s6 = int_to_ptr.vmem [resolvable:$true] %s331_s6 }
  0x3d   : > { %s318_s11 = scalar_lea.sflag [#allocation4], %s192_s27  ;;  %s529_s18 = scalar_lea.vmem %s765_s6, 16 }
  0x3e   : > { %v207_v6 = vmul.f32 %v206_v4, %v205_v3  ;;  %p530_p8 = scmp.ne.s32.totalorder %s765_s6, %s529_s18  ;;  %p830_p10 = scmp.ne.s32.totalorder %s823_s22, 0 }
  0x3f   : > { %s620_s15 = smov [#allocation5]  }
  0x40   : > { %v737_v7 = vadd.f32 %v208_v5, %v207_v6  ;;  %p531_p11 = pnand %p530_p8, %p830_p10  ;;  %s533_s19 = sshll.u32 %s620_s15, 4  ;;  %s534_s19 = int_to_ptr.vmem [resolvable:$false] %s533_s19 }
  0x41   : > { %s535_s21 = scalar_lea.vmem %s534_s19, 32  ;;  %p536_p1 = scmp.lt.s32.totalorder %s765_s6, %s534_s19 }
  0x42   : > { %v213_v8 = vand.u32 2139095040, %v737_v7  ;;  %v210_v10 = vand.u32 2147483647, %v737_v7  ;;  %vm212_vm7 = vcmp.lt.s32.totalorder %v737_v7, 0  ;;  %vm302_vm12 = vweird.f32 %v737_v7  ;;  %p532_p13 = pneg %p531_p11  ;;  %p537_p3 = scmp.lt.s32.totalorder %s535_s21, %s529_s18 }
  0x44   : > { %v214_v9 = vshrl.u32 %v213_v8, 23  ;;  %v217_v13 = vand.u32 8388607, %v210_v10  ;;  %vm211_vm8 = vcmp.le.f32.partialorder %v210_v10, 0.7853982  ;;  %p538_p5 = por %p537_p3, %p536_p1 }
  0x46   : > { %v414_v11 = vadd.s32 4294967169, %v214_v9  ;;  %v218_v16 = vor.u32 8388608, %v217_v13  ;;  %p539_p6 = pnand %p538_p5, %p532_p13 }
  0x48   : > { %v220_v12 = vadd.s32 1, %v414_v11  ;;  %v258_v36 = vshll.u32 %v218_v16, 8 }
  0x4a   : > { %vm221_vm0 = vcmp.gt.s32.totalorder %v220_v12, 0 }
  0x4b   : > { %v222_v14 = vsel %vm221_vm0, %v220_v12, 0 }
  0x4c   : > { %v224_v15 = vand.u32 31, %v222_v14  ;;  %v223_v17 = vshrl.u32 %v222_v14, 5 }
  0x4e   : > { %v225_v18 = vsub.s32 32, %v224_v15  ;;  %v227_v20 = vshll.u32 %v614_v19, %v224_v15  ;;  %v230_v22 = vshll.u32 %v615_v21, %v224_v15  ;;  %v233_v24 = vshll.u32 %v616_v23, %v224_v15 }
  0x4f   : > { %v236_v26 = vshll.u32 %v617_v25, %v224_v15  ;;  %v239_v28 = vshll.u32 %v618_v27, %v224_v15  ;;  %vm242_vm1 = vcmp.lt.s32.totalorder %v223_v17, 1  ;;  %vm245_vm2 = vcmp.lt.s32.totalorder %v223_v17, 4 }
  0x50   : > { %v226_v29 = vshrl.u32 %v614_v19, %v225_v18  ;;  %v228_v30 = vshrl.u32 %v615_v21, %v225_v18  ;;  %v231_v31 = vshrl.u32 %v616_v23, %v225_v18  ;;  %v234_v32 = vshrl.u32 %v617_v25, %v225_v18 }
  0x51   : > { %v237_v33 = vshrl.u32 %v618_v27, %v225_v18  ;;  %v240_v35 = vshrl.u32 %v619_v34, %v225_v18  ;;  %vm243_vm3 = vcmp.lt.s32.totalorder %v223_v17, 2  ;;  %vm244_vm4 = vcmp.lt.s32.totalorder %v223_v17, 3  ;;  %v314_v34 = vld [vmem:[%s199_s4] sm:$0x1] }
  0x52   : > { %v229_v37 = vor.u32 %v228_v30, %v227_v20  ;;  %v232_v38 = vor.u32 %v231_v31, %v230_v22  ;;  %v235_v39 = vor.u32 %v234_v32, %v233_v24 }
  0x53   : > { %v238_v40 = vor.u32 %v237_v33, %v236_v26  ;;  %v241_v41 = vor.u32 %v240_v35, %v239_v28 }
  0x54   : > { %v246_v42 = vsel %vm242_vm1, %v226_v29, %v229_v37  ;;  %v247_v43 = vsel %vm245_vm2, %v235_v39, 2102212464  ;;  %v250_v44 = vsel %vm242_vm1, %v229_v37, %v232_v38  ;;  %v254_v45 = vsel %vm242_vm1, %v232_v38, %v235_v39 }
  0x55   : > { %v248_v46 = vsel %vm244_vm4, %v232_v38, %v247_v43  ;;  %v251_v47 = vsel %vm245_vm2, %v238_v40, 920167782  ;;  %v255_v48 = vsel %vm245_vm2, %v241_v41, 1326507024 }
  0x56   : > { %v252_v49 = vsel %vm244_vm4, %v235_v39, %v251_v47  ;;  %v256_v50 = vsel %vm244_vm4, %v238_v40, %v255_v48  ;;  %v249_v51 = vsel %vm243_vm3, %v246_v42, %v248_v46 }
  0x57   : > { %v253_v52 = vsel %vm243_vm3, %v250_v44, %v252_v49  ;;  %v257_v53 = vsel %vm243_vm3, %v254_v45, %v256_v50  ;;  %v265_v58 = vmul.u32 %v258_v36, %v249_v51 }
  0x58   : > { %v743_v54 = vmul.u32.u64.low %v258_v36, %v257_v53  ;;  %v744_v55 = vmul.u32.u64.high %v258_v36, %v257_v53, %v743_v54  ;;  %v746_v56 = vmul.u32.u64.low %v258_v36, %v253_v52  ;;  %v747_v57 = vmul.u32.u64.high %v258_v36, %v253_v52, %v746_v56 }
  0x5a   : > { %vm267_vm5 = vc.u32 %v744_v55, %v746_v56  ;;  %v268_v59 = vadd.s32 1, %v747_v57  ;;  %v266_v6 = vadd.s32 %v746_v56, %v744_v55 }
  0x5c   : > { %v269_v60 = vsel %vm267_vm5, %v268_v59, %v747_v57 }
  0x5d   : > { %v270_v61 = vadd.s32 %v269_v60, %v265_v58 }
  0x5f   : > { %v271_v62 = vadd.s32 536870912, %v270_v61 }
  0x61   : > { %v272_v63 = vshrl.u32 %v271_v62, 30 }
  0x63   : > { %v273_v0 = vshll.u32 %v272_v63, 30  ;;  %v296_v20 = vsub.s32 4, %v272_v63 }
  0x65   : > { %v274_v1 = vsub.s32 %v270_v61, %v273_v0  ;;  %v297_v23 = vsel %vm212_vm7, %v296_v20, %v272_v63 }
  0x66   : > { %v299_v26 = vsel %vm211_vm8, 0, %v297_v23 }
  0x67   : > { %v276_v2 = vsub.s32 0, %v274_v1  ;;  %v303_v27 = vadd.s32 3, %v299_v26 }
  0x69   : > { %v415_v3 = vmin.u32 %v276_v2, %v274_v1  ;;  %v304_v28 = vand.u32 3, %v303_v27 }
  0x6b   : > { %v278_v4 = vclz %v415_v3  ;;  %vm309_vm9 = vcmp.eq.s32.totalorder %v304_v28, 2  ;;  %vm306_vm10 = vcmp.eq.s32.totalorder %v304_v28, 0  ;;  %vm305_vm11 = vcmp.lt.s32.totalorder %v304_v28, 2 }
  0x6d   : > { %v416_v5 = vadd.s32 4294967294, %v278_v4 }
  0x6f   : > { %vm417_vm6 = vcmp.lt.s32.totalorder %v416_v5, 0 }
  0x70   : > { %v281_v8 = vsel %vm417_vm6, 0, %v416_v5 }
  0x71   : > { %v282_v9 = vsub.s32 32, %v281_v8  ;;  %v283_v11 = vshll.u32 %v274_v1, %v281_v8  ;;  %v286_v12 = vsub.s32 4294967266, %v281_v8 }
  0x73   : > { %v284_v13 = vshrl.u32 %v266_v6, %v282_v9  ;;  %v287_v14 = vadd.s32 127, %v286_v12 }
  0x75   : > { %v285_v15 = vor.u32 %v284_v13, %v283_v11  ;;  %v288_v16 = vshll.u32 %v287_v14, 23 }
  0x77   : > { %v289_v17 = vor.u32 4788187, %v288_v16  ;;  %v292_v18 = vcvt.s32.f32 %v285_v15 }
  0x79   : > { %v290_v19 = vand.u32 2147483647, %v289_v17 }
  0x7b   : > { %v293_v21 = vmul.f32 %v292_v18, %v290_v19 }
  0x7d   : > { %v294_v22 = vxor.u32 2147483648, %v293_v21 }
  0x7f   : > { %v295_v24 = vsel %vm212_vm7, %v294_v22, %v293_v21 }
  0x80   : > { %v298_v25 = vsel %vm211_vm8, %v737_v7, %v295_v24 }
  0x81   : > { %497 = vcosq.f32 %v298_v25 }
  0x82   : > { %499 = vsinq.f32 %v298_v25 }
  0x8b   : > { %v498_v29 = vpop.eup %497 }
  0x8c   : > { %v500_v30 = vpop.eup %499  ;;  %v310_v10 = vxor.u32 2147483648, %v498_v29 }
  0x8d   : > { %v307_v31 = vxor.u32 2147483648, %v500_v30 }
  0x8e   : > { %v311_v32 = vsel %vm309_vm9, %v310_v10, %v500_v30 }
  0x8f   : > { %v308_v33 = vsel %vm306_vm10, %v498_v29, %v307_v31 }
  0x90   : > { %v312_v35 = vsel %vm305_vm11, %v308_v33, %v311_v32 }
  0x91   : > { %v313_v36 = vsel %vm302_vm12, nan, %v312_v35 }
  0x92   : > { %v315_v37 = vadd.f32 %v314_v34, %v313_v36 }
  0x94   : > { %316 = vst [vmem:[%s193_s5] sm:$0x1] %v315_v37 }
  0x95   : > { %542 = shalt.err (!%p539_p6)
}
  0x96   : > { %s543_s23 = scalar_lea.hbm %s770_s10, 16  ;;  %s547_s27 = scalar_lea.hbm %s818_s3, 32 }
  0x97   : > { %p544_p7 = scmp.ne.s32.totalorder %s770_s10, %s543_s23  ;;  %p548_p0 = scmp.lt.u32.totalorder %s770_s10, %s818_s3 }
  0x98   : > { %p549_p2 = scmp.lt.u32.totalorder %s547_s27, %s543_s23  ;;  %p551_p8 = scmp.lt.u32.totalorder %s543_s23, %s770_s10 }
  0x99   : > { %p545_p9 = pnand %p544_p7, %p830_p10 }
  0x9a   : > { %p550_p4 = por %p549_p2, %p548_p0 }
  0x9b   : > { %p546_p12 = pneg %p545_p9 }
  0x9c   : > { %p552_p11 = por %p551_p8, %p550_p4 }
  0x9e   : > { %p553_p13 = pnand %p552_p11, %p546_p12 }
  0xa0   : > { %556 = shalt.err (!%p553_p13)
}
  0xa1   : > { %429 = dma.vmem_to_hbm [thread:$0]  (%p830_p10), %s765_s6, 16, %s770_s10, %s318_s11  }
  0xa2 PF: > { %p441_p1 = scmp.ge.s32.totalorder %s611_s17, 2  ;;  %s343_s4 = sand.u32 1, %s591_s12  }
  0xa3   : > { %p831_p3 = scmp.ne.s32.totalorder %s824_s24, 0  ;;  %s344_s5 = scalar_lea.sflag [#allocation4], %s343_s4 }
  0xa5   : > { %p436_p5 = pnand %p441_p1, %p831_p3 }
  0xa7   : > { %586 = dma.done.wait (!%p436_p5), %s344_s5, 16  }
  0xa8   : > { %588 = vsyncadd (!%p436_p5), %s344_s5, 4294967280  ;;  %s17_s17 = sadd.s32 1, %s611_s17   ;;  %s832_s12 = smov %s595_s13 }
  0xa9   : > { %p14_p6 = scmp.ge.s32.totalorder %s17_s17, 4   ;;  %s833_s13 = smov %s599_s14 }
  0xaa   : > { %s834_s14 = smov %s694_s25  ;;  %s835_s15 = smov %s607_s16 }
  0xab   : > { %s836_s16 = smov %s838_s20  ;;  %16 = sbr.rel (!%p14_p6) target bundleno = 5 (0x5), region = 72 }
  0xb2   :  { %348 = vsyncpa [#allocation3], 1 }
  0xb3   :  { %350 = vsyncpa [#allocation3 + $0x1], 1 }
  0xb4   :  { %351 = vsyncpa [#allocation4], 1 }
  0xb5   :  { %353 = vsyncpa [#allocation4 + $0x1], 1 }

</bundles_post_ra>
